<compile_context>
chip_gen: v5e
topology: v5e:2x2
jax: 0.10.0
libtpu: 0.0.40
codegen_flags: <defaults>
</compile_context>

<pallas_src>
import jax
import jax.numpy as jnp
from jax.experimental import pallas as pl
from jax.experimental.pallas import tpu as pltpu


def _pinn_kernel(xt_ref, sw_ref, w0_ref, w1_ref, w2_ref, ew_ref, eb_ref, o_ref):
    # Start layer via VPU broadcast math (a K=2 matmul would be ~98% MXU pad):
    #   h[H, TM] = tanh(W[:,0] * x + W[:,1] * t + b)
    x = xt_ref[0:1, :]                       # (1, TM) lane-dense
    t = xt_ref[1:2, :]                       # (1, TM)
    h = jnp.tanh(sw_ref[:, 0:1] * x + sw_ref[:, 1:2] * t + sw_ref[:, 2:3])

    # Three low-rank blocks, each folded in the wrapper into one (H, H) weight:
    #   h <- tanh(Wk^T @ h)   with   Wk^T = row_k @ (col_k * alpha_k)^T
    # (kept f32: the MXU work is tiny vs. the EUP tanh load; bf16 would break
    #  the 2e-5 accuracy check)
    h = jnp.tanh(jnp.dot(w0_ref[...], h, preferred_element_type=jnp.float32))
    h = jnp.tanh(jnp.dot(w1_ref[...], h, preferred_element_type=jnp.float32))
    h = jnp.tanh(jnp.dot(w2_ref[...], h, preferred_element_type=jnp.float32))

    # End layer: (1, H) @ (H, TM) -> lane-dense unmasked (1, TM) store, plus a
    # scalar bias read from SMEM.
    o_ref[...] = (jnp.dot(ew_ref[...], h, preferred_element_type=jnp.float32)
                  + eb_ref[0])


def lr_pinn_phase2_midout(x, t, params, *, block_m=8192):
    """x, t: (N, 1) float32. Returns (N, 1) float32."""
    N = x.shape[0]
    H = params["start_w"].shape[0]                      # hidden_dim

    # ---- one-time weight prep (outside the sequential grid loop) ----
    sw_pack = jnp.concatenate(
        [params["start_w"].astype(jnp.float32),          # (H, 2) PyTorch (out,in)
         params["start_b"].reshape(H, 1).astype(jnp.float32)], axis=1)   # (H, 3)
    wt = []
    for k in range(3):
        coeff = params[f"col_{k}"] * params[f"alpha_{k}"][None, :]        # (H, R)
        wt.append((params[f"row_{k}"] @ coeff.T).astype(jnp.float32))     # (H, H)
    ew = params["end_w"].astype(jnp.float32)             # (1, H)
    eb = params["end_b"].reshape(1,).astype(jnp.float32)  # SMEM scalar

    # ---- batch-on-lanes layout: x/t packed into a single (2, N) operand ----
    xt = jnp.concatenate(
        [x.reshape(1, N), t.reshape(1, N)], axis=0).astype(jnp.float32)

    # ---- tile sizing ----
    # Multiple of 128, large (block_m) to amortize the ~600-cycle per-step
    # overhead, but capped so the grid keeps >= 2 steps when N allows
    # (v7x has 2 TensorCores; the single grid axis is marked "parallel").
    n128 = pl.cdiv(N, 128) * 128
    bm = min(block_m, n128)
    if n128 >= 256:
        bm = min(bm, max(128, (n128 // 2) // 128 * 128))
    bm = max(128, (bm // 128) * 128)
    n_pad = pl.cdiv(N, bm) * bm
    if n_pad != N:
        xt = jnp.pad(xt, ((0, 0), (0, n_pad - N)))
    grid = (n_pad // bm,)

    # Raise scoped VMEM only for very large tiles (v5e default is 16 MiB);
    # at the default block_m the per-step footprint is a few MiB.
    cp_kwargs = {}
    if bm >= 32768:
        cp_kwargs["vmem_limit_bytes"] = 60 * 1024 * 1024

    # Constant-index weight operands stay resident in VMEM across grid steps
    # (their index_map is constant); left at default pipeline_mode since the
    # buffers are only a few KiB.
    full = lambda shape: pl.BlockSpec(shape, lambda i: (0,) * len(shape))

    out = pl.pallas_call(
        _pinn_kernel,
        out_shape=jax.ShapeDtypeStruct((1, n_pad), jnp.float32),
        grid=grid,
        in_specs=[
            pl.BlockSpec((2, bm), lambda i: (0, i)),    # packed x/t tile
            full((H, 3)),                               # packed start W | bias
            full((H, H)), full((H, H)), full((H, H)),   # folded low-rank weights
            full((1, H)),                               # end-layer weight
            pl.BlockSpec(memory_space=pltpu.MemorySpace.SMEM),  # end bias scalar
        ],
        out_specs=pl.BlockSpec((1, bm), lambda i: (0, i)),
        compiler_params=pltpu.CompilerParams(
            dimension_semantics=("parallel",), **cp_kwargs),
    )(xt, sw_pack, wt[0], wt[1], wt[2], ew, eb)

    return out[:, :N].T                                 # (N, 1)


def _reference(x, t, params):
    """Pure-JAX reference matching the PyTorch forward semantics."""
    inputs = jnp.concatenate([x, t], axis=1)
    h = jnp.tanh(inputs @ params["start_w"].T + params["start_b"])
    for k in range(3):
        coeff = params[f"col_{k}"] @ jnp.diag(params[f"alpha_{k}"])
        h = jnp.tanh((h @ coeff) @ params[f"row_{k}"].T)
    return h @ params["end_w"].T + params["end_b"]


def _init_params(key, hidden_dim, rank):
    ks = jax.random.split(key, 13)
    f32 = jnp.float32
    scale = 0.1
    p = {
        "start_w": scale * jax.random.normal(ks[0], (hidden_dim, 2), f32),
        "start_b": scale * jax.random.normal(ks[1], (hidden_dim,), f32),
        "end_w":   scale * jax.random.normal(ks[2], (1, hidden_dim), f32),
        "end_b":   scale * jax.random.normal(ks[3], (1,), f32),
    }
    for k in range(3):
        p[f"col_{k}"] = scale * jax.random.normal(ks[4 + k], (hidden_dim, rank), f32)
        p[f"row_{k}"] = scale * jax.random.normal(ks[7 + k], (hidden_dim, rank), f32)
        p[f"alpha_{k}"] = 1.0 + 0.1 * jax.random.normal(ks[10 + k], (rank,), f32) + k
    return p


if __name__ == "__main__":
    key = jax.random.PRNGKey(0)
    kx, kt, kp = jax.random.split(key, 3)

    hidden_dim, rank = 32, 16
    params = _init_params(kp, hidden_dim, rank)

    # Exercise: aligned 1-step grid, ragged 2-step grid, ragged multi-step grid.
    for N in (128, 200, 515):
        x = jax.random.uniform(kx, (N, 1), jnp.float32)
        t = jax.random.uniform(kt, (N, 1), jnp.float32)

        out = jax.block_until_ready(lr_pinn_phase2_midout(x, t, params))
        ref = _reference(x, t, params)
        assert out.shape == (N, 1)
        assert jnp.allclose(out, ref, atol=2e-5, rtol=2e-5), f"mismatch at N={N}"

    print("KERNEL_OK")
</pallas_src>

<mosaic_0001>
module attributes {stable_mosaic.version = 11 : i64} {
  func.func @_pinn_kernel(%arg0: i32, %arg1: memref<2x128xf32, #tpu.memory_space<vmem>>, %arg2: memref<32x3xf32, #tpu.memory_space<vmem>>, %arg3: memref<32x32xf32, #tpu.memory_space<vmem>>, %arg4: memref<32x32xf32, #tpu.memory_space<vmem>>, %arg5: memref<32x32xf32, #tpu.memory_space<vmem>>, %arg6: memref<1x32xf32, #tpu.memory_space<vmem>>, %arg7: memref<1xf32, #tpu.memory_space<smem>>, %arg8: memref<1x128xf32, #tpu.memory_space<vmem>>) attributes {dimension_semantics = [#tpu.dimension_semantics<parallel>], iteration_bounds = array<i64: 1>, scalar_prefetch = 0 : i64, scratch_operands = 0 : i64, tpu.core_type = #tpu.core_type<tc>, window_params = [{transform_indices = @transform_0, window_bounds = array<i64: 2, 128>}, {pipeline_mode = #tpu.pipeline_mode<synchronous>, transform_indices = @transform_1, window_bounds = array<i64: 32, 3>}, {pipeline_mode = #tpu.pipeline_mode<synchronous>, transform_indices = @transform_2, window_bounds = array<i64: 32, 32>}, {pipeline_mode = #tpu.pipeline_mode<synchronous>, transform_indices = @transform_3, window_bounds = array<i64: 32, 32>}, {pipeline_mode = #tpu.pipeline_mode<synchronous>, transform_indices = @transform_4, window_bounds = array<i64: 32, 32>}, {pipeline_mode = #tpu.pipeline_mode<synchronous>, transform_indices = @transform_5, window_bounds = array<i64: 1, 32>}, {transform_indices = @transform_6, window_bounds = array<i64: 1>}, {transform_indices = @transform_7, window_bounds = array<i64: 1, 128>}]} {
    %c0 = arith.constant 0 : index
    %c0_0 = arith.constant 0 : index
    %0 = vector.load %arg1[%c0, %c0_0] : memref<2x128xf32, #tpu.memory_space<vmem>>, vector<1x128xf32>
    %c1 = arith.constant 1 : index
    %c0_1 = arith.constant 0 : index
    %1 = vector.load %arg1[%c1, %c0_1] : memref<2x128xf32, #tpu.memory_space<vmem>>, vector<1x128xf32>
    %c0_2 = arith.constant 0 : index
    %c0_3 = arith.constant 0 : index
    %2 = vector.load %arg2[%c0_2, %c0_3] : memref<32x3xf32, #tpu.memory_space<vmem>>, vector<32x1xf32>
    %3 = vector.broadcast %2 : vector<32x1xf32> to vector<32x128xf32>
    %4 = vector.broadcast %0 : vector<1x128xf32> to vector<32x128xf32>
    %5 = arith.mulf %3, %4 : vector<32x128xf32>
    %c0_4 = arith.constant 0 : index
    %c1_5 = arith.constant 1 : index
    %6 = vector.load %arg2[%c0_4, %c1_5] : memref<32x3xf32, #tpu.memory_space<vmem>>, vector<32x1xf32>
    %7 = vector.broadcast %6 : vector<32x1xf32> to vector<32x128xf32>
    %8 = vector.broadcast %1 : vector<1x128xf32> to vector<32x128xf32>
    %9 = arith.mulf %7, %8 : vector<32x128xf32>
    %10 = arith.addf %5, %9 : vector<32x128xf32>
    %c0_6 = arith.constant 0 : index
    %c2 = arith.constant 2 : index
    %11 = vector.load %arg2[%c0_6, %c2] : memref<32x3xf32, #tpu.memory_space<vmem>>, vector<32x1xf32>
    %12 = vector.broadcast %11 : vector<32x1xf32> to vector<32x128xf32>
    %13 = arith.addf %10, %12 : vector<32x128xf32>
    %14 = math.tanh %13 : vector<32x128xf32>
    %c0_7 = arith.constant 0 : index
    %c0_8 = arith.constant 0 : index
    %15 = vector.load %arg3[%c0_7, %c0_8] : memref<32x32xf32, #tpu.memory_space<vmem>>, vector<32x32xf32>
    %cst = arith.constant dense<0.000000e+00> : vector<32x128xf32>
    %16 = tpu.matmul %15, %14, %cst {dimension_numbers = #tpu.dot_dimension_numbers<[1], [0], [0], [1], [0, 0, 1, 1], [], []>} : vector<32x32xf32>, vector<32x128xf32>, vector<32x128xf32> -> vector<32x128xf32>
    %17 = math.tanh %16 : vector<32x128xf32>
    %c0_9 = arith.constant 0 : index
    %c0_10 = arith.constant 0 : index
    %18 = vector.load %arg4[%c0_9, %c0_10] : memref<32x32xf32, #tpu.memory_space<vmem>>, vector<32x32xf32>
    %cst_11 = arith.constant dense<0.000000e+00> : vector<32x128xf32>
    %19 = tpu.matmul %18, %17, %cst_11 {dimension_numbers = #tpu.dot_dimension_numbers<[1], [0], [0], [1], [0, 0, 1, 1], [], []>} : vector<32x32xf32>, vector<32x128xf32>, vector<32x128xf32> -> vector<32x128xf32>
    %20 = math.tanh %19 : vector<32x128xf32>
    %c0_12 = arith.constant 0 : index
    %c0_13 = arith.constant 0 : index
    %21 = vector.load %arg5[%c0_12, %c0_13] : memref<32x32xf32, #tpu.memory_space<vmem>>, vector<32x32xf32>
    %cst_14 = arith.constant dense<0.000000e+00> : vector<32x128xf32>
    %22 = tpu.matmul %21, %20, %cst_14 {dimension_numbers = #tpu.dot_dimension_numbers<[1], [0], [0], [1], [0, 0, 1, 1], [], []>} : vector<32x32xf32>, vector<32x128xf32>, vector<32x128xf32> -> vector<32x128xf32>
    %23 = math.tanh %22 : vector<32x128xf32>
    %c0_15 = arith.constant 0 : index
    %c0_16 = arith.constant 0 : index
    %24 = vector.load %arg6[%c0_15, %c0_16] : memref<1x32xf32, #tpu.memory_space<vmem>>, vector<1x32xf32>
    %cst_17 = arith.constant dense<0.000000e+00> : vector<1x128xf32>
    %25 = tpu.matmul %24, %23, %cst_17 {dimension_numbers = #tpu.dot_dimension_numbers<[1], [0], [0], [1], [0, 0, 1, 1], [], []>} : vector<1x32xf32>, vector<32x128xf32>, vector<1x128xf32> -> vector<1x128xf32>
    %c0_18 = arith.constant 0 : index
    %26 = memref.load %arg7[%c0_18] : memref<1xf32, #tpu.memory_space<smem>>
    %27 = vector.broadcast %26 : f32 to vector<1x128xf32>
    %28 = arith.addf %25, %27 : vector<1x128xf32>
    %c0_19 = arith.constant 0 : index
    %c0_20 = arith.constant 0 : index
    %29 = vector.load %arg8[%c0_19, %c0_20] : memref<1x128xf32, #tpu.memory_space<vmem>>, vector<1x128xf32>
    tpu.vector_store %arg8[%c0_19, %c0_20], %28 {strides = array<i32>} : memref<1x128xf32, #tpu.memory_space<vmem>>, vector<1x128xf32>,
    return
  }
  func.func @transform_0(%arg0: i32) -> (i32, i32) {
    %c0_i32 = arith.constant 0 : i32
    %c0_i32_0 = arith.constant 0 : i32
    return %c0_i32, %arg0 : i32, i32
  }
  func.func @transform_1(%arg0: i32) -> (i32, i32) {
    %c0_i32 = arith.constant 0 : i32
    %c0_i32_0 = arith.constant 0 : i32
    %c0_i32_1 = arith.constant 0 : i32
    return %c0_i32, %c0_i32_0 : i32, i32
  }
  func.func @transform_2(%arg0: i32) -> (i32, i32) {
    %c0_i32 = arith.constant 0 : i32
    %c0_i32_0 = arith.constant 0 : i32
    %c0_i32_1 = arith.constant 0 : i32
    return %c0_i32, %c0_i32_0 : i32, i32
  }
  func.func @transform_3(%arg0: i32) -> (i32, i32) {
    %c0_i32 = arith.constant 0 : i32
    %c0_i32_0 = arith.constant 0 : i32
    %c0_i32_1 = arith.constant 0 : i32
    return %c0_i32, %c0_i32_0 : i32, i32
  }
  func.func @transform_4(%arg0: i32) -> (i32, i32) {
    %c0_i32 = arith.constant 0 : i32
    %c0_i32_0 = arith.constant 0 : i32
    %c0_i32_1 = arith.constant 0 : i32
    return %c0_i32, %c0_i32_0 : i32, i32
  }
  func.func @transform_5(%arg0: i32) -> (i32, i32) {
    %c0_i32 = arith.constant 0 : i32
    %c0_i32_0 = arith.constant 0 : i32
    %c0_i32_1 = arith.constant 0 : i32
    return %c0_i32, %c0_i32_0 : i32, i32
  }
  func.func @transform_6(%arg0: i32) -> i32 {
    %c0_i32 = arith.constant 0 : i32
    %c0_i32_0 = arith.constant 0 : i32
    return %c0_i32 : i32
  }
  func.func @transform_7(%arg0: i32) -> (i32, i32) {
    %c0_i32 = arith.constant 0 : i32
    %c0_i32_0 = arith.constant 0 : i32
    return %c0_i32, %arg0 : i32, i32
  }
}

</mosaic_0001>

<bundles_post_ra>
// kernel: tpu_custom_call.1
= control target key start
LH: loop header
LB: loop body
LE: loop exit
PB: predicated region body
PF: predicated region fallthrough
CT: control target
= control target key end

     0   :  { %13 = vsyncpa [#allocation4], 0  ;;  %s582_s0 = inlined_call_operand.vmem [shape: f32[2,128], index: 0, kind: input, shape index: {}]   ;;  %s583_s1 = inlined_call_operand.vmem [shape: f32[32,3], index: 1, kind: input, shape index: {}]   ;;  %s584_s2 = inlined_call_operand.vmem [shape: f32[32,32], index: 2, kind: input, shape index: {}]   ;;  %s585_s3 = inlined_call_operand.hbm [shape: f32[32,32], index: 3, kind: input, shape index: {}]   ;;  %s586_s4 = inlined_call_operand.hbm [shape: f32[32,32], index: 4, kind: input, shape index: {}]   ;;  %s587_s5 = inlined_call_operand.vmem [shape: f32[1,32], index: 5, kind: input, shape index: {}]   ;;  %s588_s6 = inlined_call_operand.<no memory space> [shape: f32[1], index: 6, kind: input, shape index: {}]   ;;  %s589_s7 = inlined_call_operand.hbm [shape: f32[1,128], index: 7, kind: output, shape index: {}]  }
   0x1   :  { %14 = vsyncpa [#allocation7], 0 }
   0x2   :  { %15 = vsyncpa [#allocation5], 0  ;;  %s26_s26 = sshll.u32 %s585_s3, 4  ;;  %s476_s27 = smov [#allocation3]   ;;  %s27_s26 = int_to_ptr.hbm [resolvable:$true] %s26_s26 }
   0x3   :  { %s28_s28 = sshll.u32 %s476_s27, 4  ;;  %s39_s8 = sshll.u32 %s586_s4, 4  ;;  %s29_s28 = int_to_ptr.vmem [resolvable:$true] %s28_s28  ;;  %s40_s8 = int_to_ptr.hbm [resolvable:$true] %s39_s8 }
   0x4   :  { %s477_s9 = smov 128   ;;  %s478_s10 = smov 8  }
   0x5   :  { %34 = dma.hbm_to_vmem [thread:$0]  %s27_s26, 512, %s29_s28, [#allocation4], %s477_s9, %s477_s9, %s478_s10  }
   0x6   :  { %s479_s11 = smov [#allocation6]  }
   0x7   :  { %s41_s12 = sshll.u32 %s479_s11, 4  ;;  %s42_s12 = int_to_ptr.vmem [resolvable:$true] %s41_s12 }
   0x8   :  { %47 = dma.hbm_to_vmem [thread:$0]  %s40_s8, 512, %s42_s12, [#allocation7], %s477_s9, %s477_s9, %s478_s10  }
   0x9   :  { %470 = dma.done.wait [#allocation4], 512  }
   0xa   :  { %471 = vsyncadd [#allocation4], 4294966784 }
   0xb   :  { %472 = dma.done.wait [#allocation7], 512  }
   0xc   :  { %473 = vsyncadd [#allocation7], 4294966784  ;;  %v480_v0 = vmov 0   ;;  %v65_v1 = vld [vmem:[%s583_s1 + $0x18] sm:$0xff]  ;;  %v64_v2 = vld [vmem:[%s583_s1 + $0x10] sm:$0xff]  ;;  %v481_v4 = vmov 1  }
   0xd   :  { %356 = vset.pattern.permute.xlu1 %v480_v0  ;;  %354 = vset.pattern.permute.xlu0 %v480_v0  ;;  %v63_v3 = vld [vmem:[%s583_s1 + $0x8] sm:$0xff]  ;;  %v62_v5 = vld [vmem:[%s583_s1] sm:$0xff]  ;;  %v482_v6 = vmov 2   ;;  %vm144_vm0 = vcmask 261120   ;;  %v142_v43 = vld [vmem:[%s584_s2 + $0x10] sm:$0xff]  ;;  %s483_s9 = smov [#allocation8]  }
   0xe   :  { %358 = vset.pattern.permute.xlu2 %v480_v0  ;;  %83 = vperm.xlu0 %354, %v65_v1   ;;  %v365_v13 = vld [vmem:[%s582_s0 + $0x1] ss:$0 sm:$0xff]  ;;  %v364_v14 = vld [vmem:[%s582_s0] ss:$0 sm:$0xff]  ;;  %v141_v42 = vld [vmem:[%s584_s2 + $0x8] sm:$0xff]  ;;  %s320_s10 = sshll.u32 %s483_s9, 4  ;;  %s321_s10 = int_to_ptr.vmem [resolvable:$true] %s320_s10 }
   0xf   :  { %78 = vperm.xlu1 %356, %v64_v2   ;;  %73 = vperm.xlu2 %358, %v63_v3   ;;  %v140_v40 = vld [vmem:[%s584_s2] sm:$0xff]  ;;  %v143_v44 = vld [vmem:[%s584_s2 + $0x18] sm:$0xff]  ;;  %v191_v54 = vld [vmem:[#allocation3 + $0x8] sm:$0xff]  ;;  %s322_s3 = sshll.u32 %s589_s7, 4  ;;  %s323_s3 = int_to_ptr.hbm [resolvable:$true] %s322_s3 }
  0x10   :  { %v190_v52 = vld [vmem:[#allocation3] sm:$0xff]  ;;  %v192_v55 = vld [vmem:[#allocation3 + $0x10] sm:$0xff]  ;;  %v193_v56 = vld [vmem:[#allocation3 + $0x18] sm:$0xff] }
  0x16   :  { %355 = vset.pattern.permute.xlu0 %v481_v4 }
  0x17   :  { %357 = vset.pattern.permute.xlu1 %v481_v4  ;;  %104 = vperm.xlu0 %355, %v65_v1  }
  0x18   :  { %100 = vperm.xlu1 %357, %v64_v2   ;;  %359 = vset.pattern.permute.xlu2 %v481_v4  ;;  %v242_v4 = vld [vmem:[#allocation6 + $0x18] sm:$0xff] }
  0x19   :  { %96 = vperm.xlu2 %359, %v63_v3  }
  0x1f   :  { %92 = vperm.xlu0 %355, %v62_v5  }
  0x20   :  { %360 = vset.pattern.permute.xlu1 %v482_v6 }
  0x21   :  { %129 = vperm.xlu1 %360, %v65_v1   ;;  %361 = vset.pattern.permute.xlu2 %v480_v0  ;;  %v239_v0 = vld [vmem:[#allocation6] sm:$0xff] }
  0x22   :  { %68 = vperm.xlu2 %361, %v62_v5  }
  0x27   :  { %363 = vset.pattern.permute.xlu0 %v482_v6 }
  0x28   :  { %117 = vperm.xlu0 %363, %v62_v5  }
  0x29   :  { %125 = vperm.xlu1 %360, %v64_v2   ;;  %v240_v2 = vld [vmem:[#allocation6 + $0x8] sm:$0xff] }
  0x2a   :  { %362 = vset.pattern.permute.xlu2 %v482_v6 }
  0x2b   :  { %121 = vperm.xlu2 %362, %v63_v3   ;;  %v241_v3 = vld [vmem:[#allocation6 + $0x10] sm:$0xff] }
  0x69   :  { %v74_v7 = vpop.permute.xlu2 %73 }
  0x6a   :  { %v88_v21 = vmul.f32 %v364_v14, %v74_v7 }
  0x73   :  { %v97_v10 = vpop.permute.xlu2 %96 }
  0x74   :  { %v109_v22 = vmul.f32 %v365_v13, %v97_v10 }
  0x76   :  { %v113_v27 = vadd.f32 %v109_v22, %v88_v21 }
  0x7c   :  { %v69_v16 = vpop.permute.xlu2 %68 }
  0x7d   :  { %v87_v25 = vmul.f32 %v364_v14, %v69_v16 }
  0x80   :  { %v84_v9 = vpop.permute.xlu0 %83 }
  0x81   :  { %v79_v8 = vpop.permute.xlu1 %78  ;;  %v90_v17 = vmul.f32 %v364_v14, %v84_v9 }
  0x82   :  { %v89_v26 = vmul.f32 %v364_v14, %v79_v8  ;;  %v290_v14 = vstv %s588_s6 }
  0x85   :  { %v122_v29 = vpop.permute.xlu2 %121 }
  0x86   :  { %v133_v34 = vadd.f32 %v122_v29, %v113_v27 }
  0x89   :  { %v105_v11 = vpop.permute.xlu0 %104 }
  0x8a   :  { %v101_v12 = vpop.permute.xlu1 %100  ;;  %v111_v15 = vmul.f32 %v365_v13, %v105_v11 }
  0x8b   :  { %v110_v24 = vmul.f32 %v365_v13, %v101_v12  ;;  %v288_v12 = vld [vmem:[%s587_s5] sm:$0x1] }
  0x8c   :  { %v115_v19 = vadd.f32 %v111_v15, %v90_v17 }
  0x8d   :  { %v114_v30 = vadd.f32 %v110_v24, %v89_v26 }
  0x91   :  { %v93_v18 = vpop.permute.xlu0 %92 }
  0x92   :  { %v108_v28 = vmul.f32 %v365_v13, %v93_v18 }
  0x93   :  { %v130_v20 = vpop.permute.xlu1 %129 }
  0x94   :  { %v135_v23 = vadd.f32 %v130_v20, %v115_v19  ;;  %v112_v36 = vadd.f32 %v108_v28, %v87_v25 }
  0x96   :  { %366 = vtanh.f32 %v135_v23 }
  0x9a   :  { %v118_v32 = vpop.permute.xlu0 %117 }
  0x9b   :  { %v126_v31 = vpop.permute.xlu1 %125  ;;  %v132_v37 = vadd.f32 %v118_v32, %v112_v36 }
  0x9c   :  { %v367_v33 = vpop.eup %366  ;;  %v134_v35 = vadd.f32 %v126_v31, %v114_v30 }
  0x9d   :  { %169 = vmatpush.msra.mxu0 %v367_v33 }
  0x9e   :  { %368 = vtanh.f32 %v134_v35 }
  0x9f   :  { %370 = vtanh.f32 %v133_v34 }
  0xa0   :  { %372 = vtanh.f32 %v132_v37 }
  0xa4   :  { %v369_v38 = vpop.eup %368 }
  0xa5   :  { %170 = vmatpush.msra.mxu0 %v369_v38  ;;  %v371_v39 = vpop.eup %370 }
  0xa6   :  { %v373_v41 = vpop.eup %372 }
  0xa7   :  { %171 = vmatpush.msra.mxu0 %v371_v39 }
  0xa9   :  { %172 = vmatpush.msra.mxu0 %v373_v41 }
  0xaa   :  { %333 = vmatmul.msk.f32.vlgmr.msra.gmra.mxu0 %vm144_vm0, %v140_v40 }
  0xb2   :  { %334 = vmatmul.msk.f32.gmra.mxu0 %vm144_vm0, %v141_v42 }
  0xba   :  { %335 = vmatmul.msk.f32.gmra.mxu0 %vm144_vm0, %v142_v43 }
  0xc2   :  { %336 = vmatmul.msk.f32.gmra.mxu0 %vm144_vm0, %v143_v44 }
 0x127   :  { %v174_v45 = vpop.f32.mrf.mxu0 }
 0x12f   :  { %v177_v46 = vpop.f32.mrf.mxu0 }
 0x137   :  { %v180_v47 = vpop.f32.mrf.mxu0 }
 0x13f   :  { %v183_v48 = vpop.f32.mrf.mxu0 }
 0x140   :  { %374 = vtanh.f32 %v183_v48 }
 0x141   :  { %376 = vtanh.f32 %v180_v47 }
 0x142   :  { %378 = vtanh.f32 %v177_v46 }
 0x143   :  { %380 = vtanh.f32 %v174_v45 }
 0x146   :  { %v375_v49 = vpop.eup %374 }
 0x147   :  { %218 = vmatpush.msra.mxu1 %v375_v49  ;;  %v377_v50 = vpop.eup %376 }
 0x148   :  { %v379_v51 = vpop.eup %378 }
 0x149   :  { %219 = vmatpush.msra.mxu1 %v377_v50  ;;  %v381_v53 = vpop.eup %380 }
 0x14b   :  { %220 = vmatpush.msra.mxu1 %v379_v51 }
 0x14d   :  { %221 = vmatpush.msra.mxu1 %v381_v53 }
 0x14e   :  { %337 = vmatmul.msk.f32.vlgmr.msra.gmra.mxu1 %vm144_vm0, %v190_v52 }
 0x156   :  { %338 = vmatmul.msk.f32.gmra.mxu1 %vm144_vm0, %v191_v54 }
 0x15e   :  { %339 = vmatmul.msk.f32.gmra.mxu1 %vm144_vm0, %v192_v55 }
 0x166   :  { %340 = vmatmul.msk.f32.gmra.mxu1 %vm144_vm0, %v193_v56 }
 0x1cb   :  { %v223_v57 = vpop.f32.mrf.mxu1 }
 0x1d3   :  { %v226_v58 = vpop.f32.mrf.mxu1 }
 0x1db   :  { %v229_v59 = vpop.f32.mrf.mxu1 }
 0x1e3   :  { %v232_v60 = vpop.f32.mrf.mxu1 }
 0x1e4   :  { %382 = vtanh.f32 %v232_v60 }
 0x1e5   :  { %384 = vtanh.f32 %v229_v59 }
 0x1e6   :  { %386 = vtanh.f32 %v226_v58 }
 0x1e7   :  { %388 = vtanh.f32 %v223_v57 }
 0x1ea   :  { %v383_v61 = vpop.eup %382 }
 0x1eb   :  { %267 = vmatpush.msra.mxu2 %v383_v61  ;;  %v385_v62 = vpop.eup %384 }
 0x1ec   :  { %v387_v63 = vpop.eup %386 }
 0x1ed   :  { %268 = vmatpush.msra.mxu2 %v385_v62  ;;  %v389_v1 = vpop.eup %388 }
 0x1ef   :  { %269 = vmatpush.msra.mxu2 %v387_v63 }
 0x1f1   :  { %270 = vmatpush.msra.mxu2 %v389_v1 }
 0x1f2   :  { %341 = vmatmul.msk.f32.vlgmr.msra.gmra.mxu2 %vm144_vm0, %v239_v0 }
 0x1fa   :  { %342 = vmatmul.msk.f32.gmra.mxu2 %vm144_vm0, %v240_v2 }
 0x202   :  { %343 = vmatmul.msk.f32.gmra.mxu2 %vm144_vm0, %v241_v3 }
 0x20a   :  { %344 = vmatmul.msk.f32.gmra.mxu2 %vm144_vm0, %v242_v4 }
 0x275   :  { %v272_v5 = vpop.f32.mrf.mxu2 }
 0x27d   :  { %v275_v6 = vpop.f32.mrf.mxu2 }
 0x285   :  { %v278_v7 = vpop.f32.mrf.mxu2 }
 0x28d   :  { %v281_v8 = vpop.f32.mrf.mxu2 }
 0x28e   :  { %390 = vtanh.f32 %v281_v8 }
 0x28f   :  { %392 = vtanh.f32 %v278_v7 }
 0x290   :  { %394 = vtanh.f32 %v275_v6 }
 0x291   :  { %396 = vtanh.f32 %v272_v5 }
 0x294   :  { %v391_v9 = vpop.eup %390 }
 0x295   :  { %306 = vmatpush.msra.mxu3 %v391_v9  ;;  %v393_v10 = vpop.eup %392 }
 0x296   :  { %v395_v11 = vpop.eup %394 }
 0x297   :  { %307 = vmatpush.msra.mxu3 %v393_v10  ;;  %v397_v13 = vpop.eup %396 }
 0x299   :  { %308 = vmatpush.msra.mxu3 %v395_v11 }
 0x29b   :  { %309 = vmatpush.msra.mxu3 %v397_v13 }
 0x29c   :  { %345 = vmatmul.msk.f32.vlgmr.msra.gmra.mxu3 %vm144_vm0, %v288_v12 }
 0x31f   :  { %v311_v15 = vpop.f32.mrf.mxu3 }
 0x320   :  { %v312_v16 = vadd.f32 %v311_v15, %v290_v14 }
 0x322   :  { %314 = vst [vmem:[#allocation8] sm:$0x1] %v312_v16 }
 0x323   :  { %325 = dma.vmem_to_hbm [thread:$0]  %s321_s10, 16, %s323_s3, [#allocation5]  }
 0x324   :  { %474 = dma.done.wait [#allocation5], 16  }
 0x325   :  { %475 = vsyncadd [#allocation5], 4294967280 }
 0x326   :  { %330 = vsyncpa [#allocation4], 1 }
 0x327   :  { %331 = vsyncpa [#allocation7], 1 }
 0x328   :  { %332 = vsyncpa [#allocation5], 1 }

</bundles_post_ra>
